<compile_context>
chip_gen: v7x
topology: tpu7x:2x2x1
jax: 0.10.0
libtpu: 0.0.40
codegen_flags: <defaults>
</compile_context>

<pallas_src>
import functools
import numpy as np
import jax
import jax.numpy as jnp
from jax.experimental import pallas as pl
from jax.experimental.pallas import tpu as pltpu


# ----------------------- Kernel A: backbone / trigger id --------------------
# All tensors transposed so G*N sits on the lane axis:
#   aT  : (S, G*N)   xT : (F, G*N)   segT : (G, G*N)
#   weights pre-transposed to (out, in), biases to (out, 1).
# Output: (2, G*N) lane-dense slab, row 0 = trigger_id, row 1 = trigger_l.
def _backbone_kernel(aT_ref, xT_ref, segT_ref,
                     wv1_ref, bv1_ref, wv2_ref, bv2_ref,
                     wf1_ref, bf1_ref, wf2_ref, bf2_ref,
                     out_ref):
    aT = aT_ref[...]
    xT = xT_ref[...]

    # self.view(...): Dropout(noop) -> Linear -> ReLU -> Dropout -> Linear,
    # then args.topo_activation == 'relu'
    h = jnp.maximum(
        jnp.dot(wv1_ref[...], aT, preferred_element_type=jnp.float32)
        + bv1_ref[...], 0.0)
    ya = jnp.maximum(
        jnp.dot(wv2_ref[...], h, preferred_element_type=jnp.float32)
        + bv2_ref[...], 0.0)

    # self.view_feat(...), then args.feat_activation == 'relu'
    hx = jnp.maximum(
        jnp.dot(wf1_ref[...], xT, preferred_element_type=jnp.float32)
        + bf1_ref[...], 0.0)
    yx = jnp.maximum(
        jnp.dot(wf2_ref[...], hx, preferred_element_type=jnp.float32)
        + bf2_ref[...], 0.0)

    # AdaptiveAvgPool1d(1) over the feature dim -> one scalar per node (lane)
    ra = jnp.mean(ya, axis=0, keepdims=True)        # (1, G*N)
    rx = jnp.mean(yx, axis=0, keepdims=True)        # (1, G*N)
    tid = ra * rx                                    # (1, G*N)

    segT = segT_ref[...]                             # (G, G*N), 1.0 for valid rows
    rowvalid = jnp.sum(segT, axis=0, keepdims=True)  # (1, G*N)
    tid_m = tid * rowvalid                           # zero rows >= nodenums[g]

    counts = jnp.sum(segT, axis=1, keepdims=True)            # (G, 1) == nodenums
    sums = jnp.sum(segT * tid_m, axis=1, keepdims=True)      # (G, 1)
    mean_g = sums / jnp.maximum(counts, 1.0)                 # guard nodenums == 0
    mean_row = jnp.sum(segT * mean_g, axis=0, keepdims=True)  # (1, G*N)

    # GradWhere forward: 1.0 where >= per-graph mean else 0.0 (valid rows only)
    tl = jnp.where(jnp.logical_and(rowvalid > 0.5, tid >= mean_row), 1.0, 0.0)

    out_ref[0:1, :] = tid_m
    out_ref[1:2, :] = tl


def run_backbone(aT, xT, segT, view_p_T, viewf_p_T):
    S, GN = aT.shape
    F = xT.shape[0]
    G = segT.shape[0]
    wv1, bv1, wv2, bv2 = view_p_T
    wf1, bf1, wf2, bf2 = viewf_p_T
    full2d = lambda shape: pl.BlockSpec(shape, lambda i: (0, 0))
    return pl.pallas_call(
        _backbone_kernel,
        grid=(1,),
        in_specs=[
            full2d((S, GN)), full2d((F, GN)), full2d((G, GN)),
            full2d((S, S)), full2d((S, 1)), full2d((S, S)), full2d((S, 1)),
            full2d((F, F)), full2d((F, 1)), full2d((F, F)), full2d((F, 1)),
        ],
        out_specs=pl.BlockSpec((2, GN), lambda i: (0, 0)),
        out_shape=jax.ShapeDtypeStruct((2, GN), jnp.float32),
        compiler_params=pltpu.CompilerParams(dimension_semantics=("arbitrary",)),
    )(aT, xT, segT, wv1, bv1, wv2, bv2, wf1, bf1, wf2, bf2)


# ----------------------- Kernel BC: fused topo + feat trigger ---------------
def _trigger_kernel(ain_ref, xin_ref, ida_ref, idf_ref,
                    wa1_ref, ba1_ref, wa2_ref, ba2_ref,
                    wx1_ref, bx1_ref, wx2_ref, bx2_ref,
                    tmask_ref, fmask_ref,
                    outA_ref, outX_ref, *, topo_thrd):
    # ---- topology path (for_whom == 'topo')
    a = ain_ref[0] * ida_ref[...]                    # (N, S) * (S, S), N == S
    h = jnp.maximum(
        jnp.dot(a, wa1_ref[...], preferred_element_type=jnp.float32)
        + ba1_ref[...], 0.0)
    y = jnp.dot(h, wa2_ref[...], preferred_element_type=jnp.float32) + ba2_ref[...]
    y = jnp.maximum(y, 0.0)                          # topo_activation == 'relu'
    y = (y + y.T) * 0.5                              # symmetrize
    y = jnp.where(y >= topo_thrd, 1.0, 0.0)          # GradWhere(y, topo_thrd)
    outA_ref[0] = y * tmask_ref[0]

    # ---- feature path (for_whom == 'feat', binaryfeat == False)
    x = xin_ref[0] * idf_ref[...]                    # (N, F) * (S, F)
    hx = jnp.maximum(
        jnp.dot(x, wx1_ref[...], preferred_element_type=jnp.float32)
        + bx1_ref[...], 0.0)
    z = jnp.dot(hx, wx2_ref[...], preferred_element_type=jnp.float32) + bx2_ref[...]
    z = jnp.maximum(z, 0.0)                          # feat_activation == 'relu'
    outX_ref[0] = z * fmask_ref[0]


def run_triggers(Ain, Xin, id_output, id_output_feat, topomask, featmask,
                 layers_p, layersf_p, topo_thrd):
    G, N, S = Ain.shape
    F = Xin.shape[-1]
    w1, b1, w2, b2 = layers_p
    v1, c1, v2, c2 = layersf_p
    kernel = functools.partial(_trigger_kernel, topo_thrd=float(topo_thrd))
    shared = lambda shape: pl.BlockSpec(shape, lambda g: (0, 0))
    per_g = lambda shape: pl.BlockSpec(shape, lambda g: (g, 0, 0))
    return pl.pallas_call(
        kernel,
        grid=(G,),
        in_specs=[
            per_g((1, N, S)), per_g((1, N, F)),
            shared((S, S)), shared((S, F)),
            shared((S, S)), shared((1, S)), shared((S, S)), shared((1, S)),
            shared((F, F)), shared((1, F)), shared((F, F)), shared((1, F)),
            per_g((1, N, S)), per_g((1, N, F)),
        ],
        out_specs=(per_g((1, N, S)), per_g((1, N, F))),
        out_shape=(jax.ShapeDtypeStruct((G, N, S), jnp.float32),
                   jax.ShapeDtypeStruct((G, N, F), jnp.float32)),
        compiler_params=pltpu.CompilerParams(dimension_semantics=("parallel",)),
    )(Ain, Xin, id_output, id_output_feat,
      w1, b1, w2, b2, v1, c1, v2, c2, topomask, featmask)


# ----------------------------- parameters -----------------------------------
def init_linear(key, din, dout, scale=0.1):
    kw, kb = jax.random.split(key)
    W = jax.random.normal(kw, (din, dout), jnp.float32) * scale
    b = jax.random.normal(kb, (1, dout), jnp.float32) * scale
    return W, b


def init_generator_params(key, sq_dim, feat_dim):
    keys = jax.random.split(key, 10)
    layers_p = init_linear(keys[0], sq_dim, sq_dim) + init_linear(keys[1], sq_dim, sq_dim)
    layersf_p = init_linear(keys[2], feat_dim, feat_dim) + init_linear(keys[3], feat_dim, feat_dim)
    view_p = init_linear(keys[4], sq_dim, sq_dim) + init_linear(keys[5], sq_dim, sq_dim)
    viewf_p = init_linear(keys[6], feat_dim, feat_dim) + init_linear(keys[7], feat_dim, feat_dim)
    # self.mlp: Linear(1, sq_dim*sq_dim);  self.mlp_feat: Linear(1, sq_dim*feat_dim)
    mlp_W = jax.random.normal(keys[8], (sq_dim * sq_dim,), jnp.float32) * 0.1
    mlp_b = jnp.zeros((sq_dim * sq_dim,), jnp.float32)
    mlpf_W = jax.random.normal(keys[9], (sq_dim * feat_dim,), jnp.float32) * 0.1
    mlpf_b = jnp.zeros((sq_dim * feat_dim,), jnp.float32)
    return dict(layers=layers_p, layers_feat=layersf_p, view=view_p,
                view_feat=viewf_p, mlp=(mlp_W, mlp_b), mlp_feat=(mlpf_W, mlpf_b))


# ---------------------- device-side forward (fully on TPU) ------------------
@functools.partial(jax.jit, static_argnames=("trigger_size", "topo_thrd"))
def generator_device(params, id_value, Ainput, Xinput, nodenums,
                     trigger_size, topo_thrd):
    G, N, S = Ainput.shape
    F = Xinput.shape[-1]
    GN = G * N

    # ---- lane-dense transposed views of the batch (layout plumbing only)
    aT = jnp.transpose(Ainput, (2, 0, 1)).reshape(S, GN)     # (S, G*N)
    xT = jnp.transpose(Xinput, (2, 0, 1)).reshape(F, GN)     # (F, G*N)

    # ---- segment / validity matrix: segT[g, r] = 1 iff flat row r belongs to
    #      graph g and (r % N) < nodenums[g]
    gidx = jnp.arange(GN, dtype=jnp.int32) // N
    ridx = jnp.arange(GN, dtype=jnp.int32) % N
    valid = ridx < nodenums[gidx]                            # (G*N,)
    segT = ((jnp.arange(G, dtype=jnp.int32)[:, None] == gidx[None, :])
            & valid[None, :]).astype(jnp.float32)            # (G, G*N)

    # ---- Kernel A (collapsed batch, lane-dense output)
    wv1, bv1, wv2, bv2 = params["view"]
    wf1, bf1, wf2, bf2 = params["view_feat"]
    packed = run_backbone(aT, xT, segT,
                          (wv1.T, bv1.T, wv2.T, bv2.T),
                          (wf1.T, bf1.T, wf2.T, bf2.T))      # (2, G*N)
    trigger_id = packed[0].reshape(G, N, 1)
    trigger_l = packed[1].reshape(G, N, 1)

    # ---- on-device descending top-k node selection + mask construction
    K = min(int(trigger_size), N)
    tid_gn = packed[0].reshape(G, N)
    valid_gn = valid.reshape(G, N)
    masked_vals = jnp.where(valid_gn, tid_gn, -jnp.inf)
    _, top_idx = jax.lax.top_k(masked_vals, K)               # (G, K)
    k_eff = jnp.minimum(nodenums, K)                         # per-graph trigger size
    keep = jnp.arange(K, dtype=jnp.int32)[None, :] < k_eff[:, None]   # (G, K)
    node_sel = jnp.sum(
        jax.nn.one_hot(top_idx, N, dtype=jnp.float32) * keep[..., None].astype(jnp.float32),
        axis=1)                                              # (G, N) in {0, 1}
    # TODO(synk): init_trigger / gen_mask / gen_input operate on networkx graph
    # objects; masks and trigger inputs are synthesized from the selected nodes.
    topomask = node_sel[:, :, None] * node_sel[:, None, :]   # (G, N, N)
    featmask = jnp.broadcast_to(node_sel[:, :, None], (G, N, F))
    Ainput_trigger = Ainput
    Xinput_trigger = Xinput

    # ---- id -> mlp / mlp_feat (Linear(1, .)): scalar affine
    mlp_W, mlp_b = params["mlp"]
    mlpf_W, mlpf_b = params["mlp_feat"]
    id_output = (mlp_W * id_value + mlp_b).reshape(S, S)
    id_output_feat = (mlpf_W * id_value + mlpf_b).reshape(S, F)

    # ---- Kernel BC (fused topo + feat trigger generation)
    rst_bkdA, rst_bkdX = run_triggers(Ainput_trigger, Xinput_trigger,
                                      id_output, id_output_feat,
                                      topomask, featmask,
                                      params["layers"], params["layers_feat"],
                                      topo_thrd)
    return rst_bkdA, rst_bkdX, trigger_id, trigger_l, top_idx, keep


# ----------------------------- forward (module) ------------------------------
def generator_forward(params, id_value, Ainput, Xinput, nodenums,
                      trigger_size, topo_thrd=0.5):
    G, N, S = Ainput.shape
    if N != S:
        raise ValueError(f"Generator assumes sq_dim == nodemax (got N={N}, S={S})")

    rst_bkdA, rst_bkdX, trigger_id, trigger_l, top_idx, keep = generator_device(
        params, jnp.asarray(float(id_value), jnp.float32),
        Ainput, Xinput, nodenums,
        trigger_size=int(trigger_size), topo_thrd=float(topo_thrd))

    # ---- single host sync at the very end (variable-n per-graph containers)
    nodenums_np = np.asarray(nodenums)
    top_idx_np = np.asarray(top_idx)
    keep_np = np.asarray(keep)
    bkd_nid_groups = {
        g: [int(top_idx_np[g, i]) for i in range(top_idx_np.shape[1]) if keep_np[g, i]]
        for g in range(G)}

    # TODO(synk): networkx g.add_edge / node_tags-from-degree bookkeeping has no
    # Pallas equivalent and is omitted; init_dr edge_mat / node_features are
    # synthesized (zeros / Xinput) in place of init_trigger().
    bkd_edge_mats = {}
    bkd_node_features = {}
    for g in range(G):
        n = int(nodenums_np[g])
        init_edge = jnp.zeros((n, n), jnp.float32)
        init_feat = Xinput[g, :n, :]
        bkd_edge_mats[g] = init_edge + rst_bkdA[g, :n, :n]
        bkd_node_features[g] = rst_bkdX[g, :n, :] + init_feat

    # TODO(synk): GradWhere straight-through backward (custom_vjp) not needed
    # for this forward-only implementation.
    edges_len_avg = 0
    return (bkd_edge_mats, bkd_node_features, bkd_nid_groups, edges_len_avg,
            trigger_size, trigger_id, trigger_l)


# ----------------------------------- main ------------------------------------
if __name__ == "__main__":
    G = 2            # number of backdoored graphs (bkd_gids_train)
    N = 16           # nodemax
    SQ_DIM = 16      # sq_dim (== nodemax for the adjacency path)
    FEAT_DIM = 32    # feat_dim
    TRIGGER_SIZE = 3

    key = jax.random.PRNGKey(0)
    k_par, k_a, k_x = jax.random.split(key, 3)

    params = init_generator_params(k_par, SQ_DIM, FEAT_DIM)

    Ainput = jax.random.normal(k_a, (G, N, SQ_DIM), jnp.float32)
    Xinput = jax.random.normal(k_x, (G, N, FEAT_DIM), jnp.float32)
    nodenums = jnp.array([12, 16], dtype=jnp.int32)

    out = generator_forward(params, id_value=3.0,
                            Ainput=Ainput, Xinput=Xinput, nodenums=nodenums,
                            trigger_size=TRIGGER_SIZE, topo_thrd=0.5)

    (bkd_edge_mats, bkd_node_features, bkd_nid_groups, edges_len_avg,
     trigger_size, trigger_id, trigger_l) = out

    jax.block_until_ready(trigger_id)
    jax.block_until_ready(trigger_l)
    for g in range(G):
        jax.block_until_ready(bkd_edge_mats[g])
        jax.block_until_ready(bkd_node_features[g])

    print("KERNEL_OK")
</pallas_src>

<mosaic_0001>
module attributes {stable_mosaic.version = 11 : i64} {
  func.func @_backbone_kernel(%arg0: i32, %arg1: memref<16x32xf32, #tpu.memory_space<vmem>>, %arg2: memref<32x32xf32, #tpu.memory_space<vmem>>, %arg3: memref<2x32xf32, #tpu.memory_space<vmem>>, %arg4: memref<16x16xf32, #tpu.memory_space<vmem>>, %arg5: memref<16x1xf32, #tpu.memory_space<vmem>>, %arg6: memref<16x16xf32, #tpu.memory_space<vmem>>, %arg7: memref<16x1xf32, #tpu.memory_space<vmem>>, %arg8: memref<32x32xf32, #tpu.memory_space<vmem>>, %arg9: memref<32x1xf32, #tpu.memory_space<vmem>>, %arg10: memref<32x32xf32, #tpu.memory_space<vmem>>, %arg11: memref<32x1xf32, #tpu.memory_space<vmem>>, %arg12: memref<2x32xf32, #tpu.memory_space<vmem>>) attributes {dimension_semantics = [#tpu.dimension_semantics<arbitrary>], iteration_bounds = array<i64: 1>, scalar_prefetch = 0 : i64, scratch_operands = 0 : i64, tpu.core_type = #tpu.core_type<tc>, window_params = [{pipeline_mode = #tpu.pipeline_mode<synchronous>, transform_indices = @transform_0, window_bounds = array<i64: 16, 32>}, {pipeline_mode = #tpu.pipeline_mode<synchronous>, transform_indices = @transform_1, window_bounds = array<i64: 32, 32>}, {pipeline_mode = #tpu.pipeline_mode<synchronous>, transform_indices = @transform_2, window_bounds = array<i64: 2, 32>}, {pipeline_mode = #tpu.pipeline_mode<synchronous>, transform_indices = @transform_3, window_bounds = array<i64: 16, 16>}, {pipeline_mode = #tpu.pipeline_mode<synchronous>, transform_indices = @transform_4, window_bounds = array<i64: 16, 1>}, {pipeline_mode = #tpu.pipeline_mode<synchronous>, transform_indices = @transform_5, window_bounds = array<i64: 16, 16>}, {pipeline_mode = #tpu.pipeline_mode<synchronous>, transform_indices = @transform_6, window_bounds = array<i64: 16, 1>}, {pipeline_mode = #tpu.pipeline_mode<synchronous>, transform_indices = @transform_7, window_bounds = array<i64: 32, 32>}, {pipeline_mode = #tpu.pipeline_mode<synchronous>, transform_indices = @transform_8, window_bounds = array<i64: 32, 1>}, {pipeline_mode = #tpu.pipeline_mode<synchronous>, transform_indices = @transform_9, window_bounds = array<i64: 32, 32>}, {pipeline_mode = #tpu.pipeline_mode<synchronous>, transform_indices = @transform_10, window_bounds = array<i64: 32, 1>}, {pipeline_mode = #tpu.pipeline_mode<synchronous>, transform_indices = @transform_11, window_bounds = array<i64: 2, 32>}]} {
    %c0 = arith.constant 0 : index
    %c0_0 = arith.constant 0 : index
    %0 = vector.load %arg1[%c0, %c0_0] : memref<16x32xf32, #tpu.memory_space<vmem>>, vector<16x32xf32>
    %c0_1 = arith.constant 0 : index
    %c0_2 = arith.constant 0 : index
    %1 = vector.load %arg2[%c0_1, %c0_2] : memref<32x32xf32, #tpu.memory_space<vmem>>, vector<32x32xf32>
    %c0_3 = arith.constant 0 : index
    %c0_4 = arith.constant 0 : index
    %2 = vector.load %arg4[%c0_3, %c0_4] : memref<16x16xf32, #tpu.memory_space<vmem>>, vector<16x16xf32>
    %cst = arith.constant dense<0.000000e+00> : vector<16x32xf32>
    %3 = tpu.matmul %2, %0, %cst {dimension_numbers = #tpu.dot_dimension_numbers<[1], [0], [0], [1], [0, 0, 1, 1], [], []>} : vector<16x16xf32>, vector<16x32xf32>, vector<16x32xf32> -> vector<16x32xf32>
    %c0_5 = arith.constant 0 : index
    %c0_6 = arith.constant 0 : index
    %4 = vector.load %arg5[%c0_5, %c0_6] : memref<16x1xf32, #tpu.memory_space<vmem>>, vector<16x1xf32>
    %5 = vector.broadcast %4 : vector<16x1xf32> to vector<16x32xf32>
    %6 = arith.addf %3, %5 : vector<16x32xf32>
    %cst_7 = arith.constant 0.000000e+00 : f32
    %7 = vector.broadcast %cst_7 : f32 to vector<16x32xf32>
    %8 = arith.maximumf %6, %7 : vector<16x32xf32>
    %c0_8 = arith.constant 0 : index
    %c0_9 = arith.constant 0 : index
    %9 = vector.load %arg6[%c0_8, %c0_9] : memref<16x16xf32, #tpu.memory_space<vmem>>, vector<16x16xf32>
    %cst_10 = arith.constant dense<0.000000e+00> : vector<16x32xf32>
    %10 = tpu.matmul %9, %8, %cst_10 {dimension_numbers = #tpu.dot_dimension_numbers<[1], [0], [0], [1], [0, 0, 1, 1], [], []>} : vector<16x16xf32>, vector<16x32xf32>, vector<16x32xf32> -> vector<16x32xf32>
    %c0_11 = arith.constant 0 : index
    %c0_12 = arith.constant 0 : index
    %11 = vector.load %arg7[%c0_11, %c0_12] : memref<16x1xf32, #tpu.memory_space<vmem>>, vector<16x1xf32>
    %12 = vector.broadcast %11 : vector<16x1xf32> to vector<16x32xf32>
    %13 = arith.addf %10, %12 : vector<16x32xf32>
    %cst_13 = arith.constant 0.000000e+00 : f32
    %14 = vector.broadcast %cst_13 : f32 to vector<16x32xf32>
    %15 = arith.maximumf %13, %14 : vector<16x32xf32>
    %c0_14 = arith.constant 0 : index
    %c0_15 = arith.constant 0 : index
    %16 = vector.load %arg8[%c0_14, %c0_15] : memref<32x32xf32, #tpu.memory_space<vmem>>, vector<32x32xf32>
    %cst_16 = arith.constant dense<0.000000e+00> : vector<32x32xf32>
    %17 = tpu.matmul %16, %1, %cst_16 {dimension_numbers = #tpu.dot_dimension_numbers<[1], [0], [0], [1], [0, 0, 1, 1], [], []>} : vector<32x32xf32>, vector<32x32xf32>, vector<32x32xf32> -> vector<32x32xf32>
    %c0_17 = arith.constant 0 : index
    %c0_18 = arith.constant 0 : index
    %18 = vector.load %arg9[%c0_17, %c0_18] : memref<32x1xf32, #tpu.memory_space<vmem>>, vector<32x1xf32>
    %19 = vector.broadcast %18 : vector<32x1xf32> to vector<32x32xf32>
    %20 = arith.addf %17, %19 : vector<32x32xf32>
    %cst_19 = arith.constant 0.000000e+00 : f32
    %21 = vector.broadcast %cst_19 : f32 to vector<32x32xf32>
    %22 = arith.maximumf %20, %21 : vector<32x32xf32>
    %c0_20 = arith.constant 0 : index
    %c0_21 = arith.constant 0 : index
    %23 = vector.load %arg10[%c0_20, %c0_21] : memref<32x32xf32, #tpu.memory_space<vmem>>, vector<32x32xf32>
    %cst_22 = arith.constant dense<0.000000e+00> : vector<32x32xf32>
    %24 = tpu.matmul %23, %22, %cst_22 {dimension_numbers = #tpu.dot_dimension_numbers<[1], [0], [0], [1], [0, 0, 1, 1], [], []>} : vector<32x32xf32>, vector<32x32xf32>, vector<32x32xf32> -> vector<32x32xf32>
    %c0_23 = arith.constant 0 : index
    %c0_24 = arith.constant 0 : index
    %25 = vector.load %arg11[%c0_23, %c0_24] : memref<32x1xf32, #tpu.memory_space<vmem>>, vector<32x1xf32>
    %26 = vector.broadcast %25 : vector<32x1xf32> to vector<32x32xf32>
    %27 = arith.addf %24, %26 : vector<32x32xf32>
    %cst_25 = arith.constant 0.000000e+00 : f32
    %28 = vector.broadcast %cst_25 : f32 to vector<32x32xf32>
    %29 = arith.maximumf %27, %28 : vector<32x32xf32>
    %cst_26 = arith.constant dense<0.000000e+00> : vector<32xf32>
    %30 = vector.multi_reduction <add>, %15, %cst_26 [0] : vector<16x32xf32> to vector<32xf32>
    %31 = vector.shape_cast %30 : vector<32xf32> to vector<1x32xf32>
    %cst_27 = arith.constant 1.600000e+01 : f32
    %32 = vector.broadcast %cst_27 : f32 to vector<1x32xf32>
    %33 = arith.divf %31, %32 : vector<1x32xf32>
    %cst_28 = arith.constant dense<0.000000e+00> : vector<32xf32>
    %34 = vector.multi_reduction <add>, %29, %cst_28 [0] : vector<32x32xf32> to vector<32xf32>
    %35 = vector.shape_cast %34 : vector<32xf32> to vector<1x32xf32>
    %cst_29 = arith.constant 3.200000e+01 : f32
    %36 = vector.broadcast %cst_29 : f32 to vector<1x32xf32>
    %37 = arith.divf %35, %36 : vector<1x32xf32>
    %38 = arith.mulf %33, %37 : vector<1x32xf32>
    %c0_30 = arith.constant 0 : index
    %c0_31 = arith.constant 0 : index
    %39 = vector.load %arg3[%c0_30, %c0_31] : memref<2x32xf32, #tpu.memory_space<vmem>>, vector<2x32xf32>
    %cst_32 = arith.constant dense<0.000000e+00> : vector<32xf32>
    %40 = vector.multi_reduction <add>, %39, %cst_32 [0] : vector<2x32xf32> to vector<32xf32>
    %41 = vector.shape_cast %40 : vector<32xf32> to vector<1x32xf32>
    %42 = arith.mulf %38, %41 : vector<1x32xf32>
    %cst_33 = arith.constant dense<0.000000e+00> : vector<2xf32>
    %43 = vector.multi_reduction <add>, %39, %cst_33 [1] : vector<2x32xf32> to vector<2xf32>
    %44 = vector.shape_cast %43 : vector<2xf32> to vector<2x1xf32>
    %45 = vector.broadcast %42 : vector<1x32xf32> to vector<2x32xf32>
    %46 = arith.mulf %39, %45 : vector<2x32xf32>
    %cst_34 = arith.constant dense<0.000000e+00> : vector<2xf32>
    %47 = vector.multi_reduction <add>, %46, %cst_34 [1] : vector<2x32xf32> to vector<2xf32>
    %48 = vector.shape_cast %47 : vector<2xf32> to vector<2x1xf32>
    %cst_35 = arith.constant 1.000000e+00 : f32
    %49 = vector.broadcast %cst_35 : f32 to vector<2x1xf32>
    %50 = arith.maximumf %44, %49 : vector<2x1xf32>
    %51 = arith.divf %48, %50 : vector<2x1xf32>
    %52 = vector.broadcast %51 : vector<2x1xf32> to vector<2x32xf32>
    %53 = arith.mulf %39, %52 : vector<2x32xf32>
    %cst_36 = arith.constant dense<0.000000e+00> : vector<32xf32>
    %54 = vector.multi_reduction <add>, %53, %cst_36 [0] : vector<2x32xf32> to vector<32xf32>
    %55 = vector.shape_cast %54 : vector<32xf32> to vector<1x32xf32>
    %cst_37 = arith.constant 5.000000e-01 : f32
    %56 = vector.broadcast %cst_37 : f32 to vector<1x32xf32>
    %57 = arith.cmpf ogt, %41, %56 : vector<1x32xf32>
    %58 = arith.cmpf oge, %38, %55 : vector<1x32xf32>
    %59 = arith.andi %57, %58 : vector<1x32xi1>
    %cst_38 = arith.constant 1.000000e+00 : f32
    %cst_39 = arith.constant 0.000000e+00 : f32
    %60 = vector.broadcast %cst_38 : f32 to vector<1x32xf32>
    %61 = vector.broadcast %cst_39 : f32 to vector<1x32xf32>
    %62 = arith.select %59, %60, %61 : vector<1x32xi1>, vector<1x32xf32>
    %c0_40 = arith.constant 0 : index
    %c0_41 = arith.constant 0 : index
    %63 = vector.load %arg12[%c0_40, %c0_41] : memref<2x32xf32, #tpu.memory_space<vmem>>, vector<1x32xf32>
    tpu.vector_store %arg12[%c0_40, %c0_41], %42 {strides = array<i32>} : memref<2x32xf32, #tpu.memory_space<vmem>>, vector<1x32xf32>,
    %c1 = arith.constant 1 : index
    %c0_42 = arith.constant 0 : index
    %64 = vector.load %arg12[%c1, %c0_42] : memref<2x32xf32, #tpu.memory_space<vmem>>, vector<1x32xf32>
    tpu.vector_store %arg12[%c1, %c0_42], %62 {strides = array<i32>} : memref<2x32xf32, #tpu.memory_space<vmem>>, vector<1x32xf32>,
    return
  }
  func.func @transform_0(%arg0: i32) -> (i32, i32) {
    %c0_i32 = arith.constant 0 : i32
    %c0_i32_0 = arith.constant 0 : i32
    %c0_i32_1 = arith.constant 0 : i32
    return %c0_i32, %c0_i32_0 : i32, i32
  }
  func.func @transform_1(%arg0: i32) -> (i32, i32) {
    %c0_i32 = arith.constant 0 : i32
    %c0_i32_0 = arith.constant 0 : i32
    %c0_i32_1 = arith.constant 0 : i32
    return %c0_i32, %c0_i32_0 : i32, i32
  }
  func.func @transform_2(%arg0: i32) -> (i32, i32) {
    %c0_i32 = arith.constant 0 : i32
    %c0_i32_0 = arith.constant 0 : i32
    %c0_i32_1 = arith.constant 0 : i32
    return %c0_i32, %c0_i32_0 : i32, i32
  }
  func.func @transform_3(%arg0: i32) -> (i32, i32) {
    %c0_i32 = arith.constant 0 : i32
    %c0_i32_0 = arith.constant 0 : i32
    %c0_i32_1 = arith.constant 0 : i32
    return %c0_i32, %c0_i32_0 : i32, i32
  }
  func.func @transform_4(%arg0: i32) -> (i32, i32) {
    %c0_i32 = arith.constant 0 : i32
    %c0_i32_0 = arith.constant 0 : i32
    %c0_i32_1 = arith.constant 0 : i32
    return %c0_i32, %c0_i32_0 : i32, i32
  }
  func.func @transform_5(%arg0: i32) -> (i32, i32) {
    %c0_i32 = arith.constant 0 : i32
    %c0_i32_0 = arith.constant 0 : i32
    %c0_i32_1 = arith.constant 0 : i32
    return %c0_i32, %c0_i32_0 : i32, i32
  }
  func.func @transform_6(%arg0: i32) -> (i32, i32) {
    %c0_i32 = arith.constant 0 : i32
    %c0_i32_0 = arith.constant 0 : i32
    %c0_i32_1 = arith.constant 0 : i32
    return %c0_i32, %c0_i32_0 : i32, i32
  }
  func.func @transform_7(%arg0: i32) -> (i32, i32) {
    %c0_i32 = arith.constant 0 : i32
    %c0_i32_0 = arith.constant 0 : i32
    %c0_i32_1 = arith.constant 0 : i32
    return %c0_i32, %c0_i32_0 : i32, i32
  }
  func.func @transform_8(%arg0: i32) -> (i32, i32) {
    %c0_i32 = arith.constant 0 : i32
    %c0_i32_0 = arith.constant 0 : i32
    %c0_i32_1 = arith.constant 0 : i32
    return %c0_i32, %c0_i32_0 : i32, i32
  }
  func.func @transform_9(%arg0: i32) -> (i32, i32) {
    %c0_i32 = arith.constant 0 : i32
    %c0_i32_0 = arith.constant 0 : i32
    %c0_i32_1 = arith.constant 0 : i32
    return %c0_i32, %c0_i32_0 : i32, i32
  }
  func.func @transform_10(%arg0: i32) -> (i32, i32) {
    %c0_i32 = arith.constant 0 : i32
    %c0_i32_0 = arith.constant 0 : i32
    %c0_i32_1 = arith.constant 0 : i32
    return %c0_i32, %c0_i32_0 : i32, i32
  }
  func.func @transform_11(%arg0: i32) -> (i32, i32) {
    %c0_i32 = arith.constant 0 : i32
    %c0_i32_0 = arith.constant 0 : i32
    %c0_i32_1 = arith.constant 0 : i32
    return %c0_i32, %c0_i32_0 : i32, i32
  }
}

module attributes {stable_mosaic.version = 11 : i64} {
  func.func @_trigger_kernel(%arg0: i32, %arg1: memref<1x16x16xf32, #tpu.memory_space<vmem>>, %arg2: memref<1x16x32xf32, #tpu.memory_space<vmem>>, %arg3: memref<16x16xf32, #tpu.memory_space<vmem>>, %arg4: memref<16x32xf32, #tpu.memory_space<vmem>>, %arg5: memref<16x16xf32, #tpu.memory_space<vmem>>, %arg6: memref<1x16xf32, #tpu.memory_space<vmem>>, %arg7: memref<16x16xf32, #tpu.memory_space<vmem>>, %arg8: memref<1x16xf32, #tpu.memory_space<vmem>>, %arg9: memref<32x32xf32, #tpu.memory_space<vmem>>, %arg10: memref<1x32xf32, #tpu.memory_space<vmem>>, %arg11: memref<32x32xf32, #tpu.memory_space<vmem>>, %arg12: memref<1x32xf32, #tpu.memory_space<vmem>>, %arg13: memref<1x16x16xf32, #tpu.memory_space<vmem>>, %arg14: memref<1x16x32xf32, #tpu.memory_space<vmem>>, %arg15: memref<1x16x16xf32, #tpu.memory_space<vmem>>, %arg16: memref<1x16x32xf32, #tpu.memory_space<vmem>>) attributes {dimension_semantics = [#tpu.dimension_semantics<parallel>], iteration_bounds = array<i64: 2>, scalar_prefetch = 0 : i64, scratch_operands = 0 : i64, tpu.core_type = #tpu.core_type<tc>, window_params = [{transform_indices = @transform_0, window_bounds = array<i64: 1, 16, 16>}, {transform_indices = @transform_1, window_bounds = array<i64: 1, 16, 32>}, {pipeline_mode = #tpu.pipeline_mode<synchronous>, transform_indices = @transform_2, window_bounds = array<i64: 16, 16>}, {pipeline_mode = #tpu.pipeline_mode<synchronous>, transform_indices = @transform_3, window_bounds = array<i64: 16, 32>}, {pipeline_mode = #tpu.pipeline_mode<synchronous>, transform_indices = @transform_4, window_bounds = array<i64: 16, 16>}, {pipeline_mode = #tpu.pipeline_mode<synchronous>, transform_indices = @transform_5, window_bounds = array<i64: 1, 16>}, {pipeline_mode = #tpu.pipeline_mode<synchronous>, transform_indices = @transform_6, window_bounds = array<i64: 16, 16>}, {pipeline_mode = #tpu.pipeline_mode<synchronous>, transform_indices = @transform_7, window_bounds = array<i64: 1, 16>}, {pipeline_mode = #tpu.pipeline_mode<synchronous>, transform_indices = @transform_8, window_bounds = array<i64: 32, 32>}, {pipeline_mode = #tpu.pipeline_mode<synchronous>, transform_indices = @transform_9, window_bounds = array<i64: 1, 32>}, {pipeline_mode = #tpu.pipeline_mode<synchronous>, transform_indices = @transform_10, window_bounds = array<i64: 32, 32>}, {pipeline_mode = #tpu.pipeline_mode<synchronous>, transform_indices = @transform_11, window_bounds = array<i64: 1, 32>}, {transform_indices = @transform_12, window_bounds = array<i64: 1, 16, 16>}, {transform_indices = @transform_13, window_bounds = array<i64: 1, 16, 32>}, {transform_indices = @transform_14, window_bounds = array<i64: 1, 16, 16>}, {transform_indices = @transform_15, window_bounds = array<i64: 1, 16, 32>}]} {
    %c0 = arith.constant 0 : index
    %c0_0 = arith.constant 0 : index
    %c0_1 = arith.constant 0 : index
    %0 = vector.load %arg1[%c0, %c0_0, %c0_1] : memref<1x16x16xf32, #tpu.memory_space<vmem>>, vector<1x16x16xf32>
    %1 = vector.shape_cast %0 : vector<1x16x16xf32> to vector<16x16xf32>
    %c0_2 = arith.constant 0 : index
    %c0_3 = arith.constant 0 : index
    %2 = vector.load %arg3[%c0_2, %c0_3] : memref<16x16xf32, #tpu.memory_space<vmem>>, vector<16x16xf32>
    %3 = arith.mulf %1, %2 : vector<16x16xf32>
    %c0_4 = arith.constant 0 : index
    %c0_5 = arith.constant 0 : index
    %4 = vector.load %arg5[%c0_4, %c0_5] : memref<16x16xf32, #tpu.memory_space<vmem>>, vector<16x16xf32>
    %cst = arith.constant dense<0.000000e+00> : vector<16x16xf32>
    %5 = tpu.matmul %3, %4, %cst {dimension_numbers = #tpu.dot_dimension_numbers<[1], [0], [0], [1], [0, 0, 1, 1], [], []>} : vector<16x16xf32>, vector<16x16xf32>, vector<16x16xf32> -> vector<16x16xf32>
    %c0_6 = arith.constant 0 : index
    %c0_7 = arith.constant 0 : index
    %6 = vector.load %arg6[%c0_6, %c0_7] : memref<1x16xf32, #tpu.memory_space<vmem>>, vector<1x16xf32>
    %7 = vector.broadcast %6 : vector<1x16xf32> to vector<16x16xf32>
    %8 = arith.addf %5, %7 : vector<16x16xf32>
    %cst_8 = arith.constant 0.000000e+00 : f32
    %9 = vector.broadcast %cst_8 : f32 to vector<16x16xf32>
    %10 = arith.maximumf %8, %9 : vector<16x16xf32>
    %c0_9 = arith.constant 0 : index
    %c0_10 = arith.constant 0 : index
    %11 = vector.load %arg7[%c0_9, %c0_10] : memref<16x16xf32, #tpu.memory_space<vmem>>, vector<16x16xf32>
    %cst_11 = arith.constant dense<0.000000e+00> : vector<16x16xf32>
    %12 = tpu.matmul %10, %11, %cst_11 {dimension_numbers = #tpu.dot_dimension_numbers<[1], [0], [0], [1], [0, 0, 1, 1], [], []>} : vector<16x16xf32>, vector<16x16xf32>, vector<16x16xf32> -> vector<16x16xf32>
    %c0_12 = arith.constant 0 : index
    %c0_13 = arith.constant 0 : index
    %13 = vector.load %arg8[%c0_12, %c0_13] : memref<1x16xf32, #tpu.memory_space<vmem>>, vector<1x16xf32>
    %14 = vector.broadcast %13 : vector<1x16xf32> to vector<16x16xf32>
    %15 = arith.addf %12, %14 : vector<16x16xf32>
    %cst_14 = arith.constant 0.000000e+00 : f32
    %16 = vector.broadcast %cst_14 : f32 to vector<16x16xf32>
    %17 = arith.maximumf %15, %16 : vector<16x16xf32>
    %18 = tpu.transpose %17, [1, 0] : vector<16x16xf32> -> vector<16x16xf32>
    %19 = arith.addf %17, %18 : vector<16x16xf32>
    %cst_15 = arith.constant 5.000000e-01 : f32
    %20 = vector.broadcast %cst_15 : f32 to vector<16x16xf32>
    %21 = arith.mulf %19, %20 : vector<16x16xf32>
    %cst_16 = arith.constant 5.000000e-01 : f32
    %22 = vector.broadcast %cst_16 : f32 to vector<16x16xf32>
    %23 = arith.cmpf oge, %21, %22 : vector<16x16xf32>
    %cst_17 = arith.constant 1.000000e+00 : f32
    %cst_18 = arith.constant 0.000000e+00 : f32
    %24 = vector.broadcast %cst_17 : f32 to vector<16x16xf32>
    %25 = vector.broadcast %cst_18 : f32 to vector<16x16xf32>
    %26 = arith.select %23, %24, %25 : vector<16x16xi1>, vector<16x16xf32>
    %c0_19 = arith.constant 0 : index
    %c0_20 = arith.constant 0 : index
    %c0_21 = arith.constant 0 : index
    %27 = vector.load %arg13[%c0_19, %c0_20, %c0_21] : memref<1x16x16xf32, #tpu.memory_space<vmem>>, vector<1x16x16xf32>
    %28 = vector.shape_cast %27 : vector<1x16x16xf32> to vector<16x16xf32>
    %29 = arith.mulf %26, %28 : vector<16x16xf32>
    %c0_22 = arith.constant 0 : index
    %c0_23 = arith.constant 0 : index
    %c0_24 = arith.constant 0 : index
    %30 = vector.load %arg15[%c0_22, %c0_23, %c0_24] : memref<1x16x16xf32, #tpu.memory_space<vmem>>, vector<1x16x16xf32>
    %31 = vector.shape_cast %30 : vector<1x16x16xf32> to vector<16x16xf32>
    %32 = vector.shape_cast %29 : vector<16x16xf32> to vector<1x16x16xf32>
    tpu.vector_store %arg15[%c0_22, %c0_23, %c0_24], %32 {strides = array<i32>} : memref<1x16x16xf32, #tpu.memory_space<vmem>>, vector<1x16x16xf32>,
    %c0_25 = arith.constant 0 : index
    %c0_26 = arith.constant 0 : index
    %c0_27 = arith.constant 0 : index
    %33 = vector.load %arg2[%c0_25, %c0_26, %c0_27] : memref<1x16x32xf32, #tpu.memory_space<vmem>>, vector<1x16x32xf32>
    %34 = vector.shape_cast %33 : vector<1x16x32xf32> to vector<16x32xf32>
    %c0_28 = arith.constant 0 : index
    %c0_29 = arith.constant 0 : index
    %35 = vector.load %arg4[%c0_28, %c0_29] : memref<16x32xf32, #tpu.memory_space<vmem>>, vector<16x32xf32>
    %36 = arith.mulf %34, %35 : vector<16x32xf32>
    %c0_30 = arith.constant 0 : index
    %c0_31 = arith.constant 0 : index
    %37 = vector.load %arg9[%c0_30, %c0_31] : memref<32x32xf32, #tpu.memory_space<vmem>>, vector<32x32xf32>
    %cst_32 = arith.constant dense<0.000000e+00> : vector<16x32xf32>
    %38 = tpu.matmul %36, %37, %cst_32 {dimension_numbers = #tpu.dot_dimension_numbers<[1], [0], [0], [1], [0, 0, 1, 1], [], []>} : vector<16x32xf32>, vector<32x32xf32>, vector<16x32xf32> -> vector<16x32xf32>
    %c0_33 = arith.constant 0 : index
    %c0_34 = arith.constant 0 : index
    %39 = vector.load %arg10[%c0_33, %c0_34] : memref<1x32xf32, #tpu.memory_space<vmem>>, vector<1x32xf32>
    %40 = vector.broadcast %39 : vector<1x32xf32> to vector<16x32xf32>
    %41 = arith.addf %38, %40 : vector<16x32xf32>
    %cst_35 = arith.constant 0.000000e+00 : f32
    %42 = vector.broadcast %cst_35 : f32 to vector<16x32xf32>
    %43 = arith.maximumf %41, %42 : vector<16x32xf32>
    %c0_36 = arith.constant 0 : index
    %c0_37 = arith.constant 0 : index
    %44 = vector.load %arg11[%c0_36, %c0_37] : memref<32x32xf32, #tpu.memory_space<vmem>>, vector<32x32xf32>
    %cst_38 = arith.constant dense<0.000000e+00> : vector<16x32xf32>
    %45 = tpu.matmul %43, %44, %cst_38 {dimension_numbers = #tpu.dot_dimension_numbers<[1], [0], [0], [1], [0, 0, 1, 1], [], []>} : vector<16x32xf32>, vector<32x32xf32>, vector<16x32xf32> -> vector<16x32xf32>
    %c0_39 = arith.constant 0 : index
    %c0_40 = arith.constant 0 : index
    %46 = vector.load %arg12[%c0_39, %c0_40] : memref<1x32xf32, #tpu.memory_space<vmem>>, vector<1x32xf32>
    %47 = vector.broadcast %46 : vector<1x32xf32> to vector<16x32xf32>
    %48 = arith.addf %45, %47 : vector<16x32xf32>
    %cst_41 = arith.constant 0.000000e+00 : f32
    %49 = vector.broadcast %cst_41 : f32 to vector<16x32xf32>
    %50 = arith.maximumf %48, %49 : vector<16x32xf32>
    %c0_42 = arith.constant 0 : index
    %c0_43 = arith.constant 0 : index
    %c0_44 = arith.constant 0 : index
    %51 = vector.load %arg14[%c0_42, %c0_43, %c0_44] : memref<1x16x32xf32, #tpu.memory_space<vmem>>, vector<1x16x32xf32>
    %52 = vector.shape_cast %51 : vector<1x16x32xf32> to vector<16x32xf32>
    %53 = arith.mulf %50, %52 : vector<16x32xf32>
    %c0_45 = arith.constant 0 : index
    %c0_46 = arith.constant 0 : index
    %c0_47 = arith.constant 0 : index
    %54 = vector.load %arg16[%c0_45, %c0_46, %c0_47] : memref<1x16x32xf32, #tpu.memory_space<vmem>>, vector<1x16x32xf32>
    %55 = vector.shape_cast %54 : vector<1x16x32xf32> to vector<16x32xf32>
    %56 = vector.shape_cast %53 : vector<16x32xf32> to vector<1x16x32xf32>
    tpu.vector_store %arg16[%c0_45, %c0_46, %c0_47], %56 {strides = array<i32>} : memref<1x16x32xf32, #tpu.memory_space<vmem>>, vector<1x16x32xf32>,
    return
  }
  func.func @transform_0(%arg0: i32) -> (i32, i32, i32) {
    %c0_i32 = arith.constant 0 : i32
    %c0_i32_0 = arith.constant 0 : i32
    %c0_i32_1 = arith.constant 0 : i32
    return %arg0, %c0_i32, %c0_i32_0 : i32, i32, i32
  }
  func.func @transform_1(%arg0: i32) -> (i32, i32, i32) {
    %c0_i32 = arith.constant 0 : i32
    %c0_i32_0 = arith.constant 0 : i32
    %c0_i32_1 = arith.constant 0 : i32
    return %arg0, %c0_i32, %c0_i32_0 : i32, i32, i32
  }
  func.func @transform_2(%arg0: i32) -> (i32, i32) {
    %c0_i32 = arith.constant 0 : i32
    %c0_i32_0 = arith.constant 0 : i32
    %c0_i32_1 = arith.constant 0 : i32
    return %c0_i32, %c0_i32_0 : i32, i32
  }
  func.func @transform_3(%arg0: i32) -> (i32, i32) {
    %c0_i32 = arith.constant 0 : i32
    %c0_i32_0 = arith.constant 0 : i32
    %c0_i32_1 = arith.constant 0 : i32
    return %c0_i32, %c0_i32_0 : i32, i32
  }
  func.func @transform_4(%arg0: i32) -> (i32, i32) {
    %c0_i32 = arith.constant 0 : i32
    %c0_i32_0 = arith.constant 0 : i32
    %c0_i32_1 = arith.constant 0 : i32
    return %c0_i32, %c0_i32_0 : i32, i32
  }
  func.func @transform_5(%arg0: i32) -> (i32, i32) {
    %c0_i32 = arith.constant 0 : i32
    %c0_i32_0 = arith.constant 0 : i32
    %c0_i32_1 = arith.constant 0 : i32
    return %c0_i32, %c0_i32_0 : i32, i32
  }
  func.func @transform_6(%arg0: i32) -> (i32, i32) {
    %c0_i32 = arith.constant 0 : i32
    %c0_i32_0 = arith.constant 0 : i32
    %c0_i32_1 = arith.constant 0 : i32
    return %c0_i32, %c0_i32_0 : i32, i32
  }
  func.func @transform_7(%arg0: i32) -> (i32, i32) {
    %c0_i32 = arith.constant 0 : i32
    %c0_i32_0 = arith.constant 0 : i32
    %c0_i32_1 = arith.constant 0 : i32
    return %c0_i32, %c0_i32_0 : i32, i32
  }
  func.func @transform_8(%arg0: i32) -> (i32, i32) {
    %c0_i32 = arith.constant 0 : i32
    %c0_i32_0 = arith.constant 0 : i32
    %c0_i32_1 = arith.constant 0 : i32
    return %c0_i32, %c0_i32_0 : i32, i32
  }
  func.func @transform_9(%arg0: i32) -> (i32, i32) {
    %c0_i32 = arith.constant 0 : i32
    %c0_i32_0 = arith.constant 0 : i32
    %c0_i32_1 = arith.constant 0 : i32
    return %c0_i32, %c0_i32_0 : i32, i32
  }
  func.func @transform_10(%arg0: i32) -> (i32, i32) {
    %c0_i32 = arith.constant 0 : i32
    %c0_i32_0 = arith.constant 0 : i32
    %c0_i32_1 = arith.constant 0 : i32
    return %c0_i32, %c0_i32_0 : i32, i32
  }
  func.func @transform_11(%arg0: i32) -> (i32, i32) {
    %c0_i32 = arith.constant 0 : i32
    %c0_i32_0 = arith.constant 0 : i32
    %c0_i32_1 = arith.constant 0 : i32
    return %c0_i32, %c0_i32_0 : i32, i32
  }
  func.func @transform_12(%arg0: i32) -> (i32, i32, i32) {
    %c0_i32 = arith.constant 0 : i32
    %c0_i32_0 = arith.constant 0 : i32
    %c0_i32_1 = arith.constant 0 : i32
    return %arg0, %c0_i32, %c0_i32_0 : i32, i32, i32
  }
  func.func @transform_13(%arg0: i32) -> (i32, i32, i32) {
    %c0_i32 = arith.constant 0 : i32
    %c0_i32_0 = arith.constant 0 : i32
    %c0_i32_1 = arith.constant 0 : i32
    return %arg0, %c0_i32, %c0_i32_0 : i32, i32, i32
  }
  func.func @transform_14(%arg0: i32) -> (i32, i32, i32) {
    %c0_i32 = arith.constant 0 : i32
    %c0_i32_0 = arith.constant 0 : i32
    %c0_i32_1 = arith.constant 0 : i32
    return %arg0, %c0_i32, %c0_i32_0 : i32, i32, i32
  }
  func.func @transform_15(%arg0: i32) -> (i32, i32, i32) {
    %c0_i32 = arith.constant 0 : i32
    %c0_i32_0 = arith.constant 0 : i32
    %c0_i32_1 = arith.constant 0 : i32
    return %arg0, %c0_i32, %c0_i32_0 : i32, i32, i32
  }
}

</mosaic_0001>

<bundles_post_ra>
// kernel: squeeze.5
= control target key start
LH: loop header
LB: loop body
LE: loop exit
PB: predicated region body
PF: predicated region fallthrough
CT: control target
= control target key end

     0   :  { %vm7_vm0 = vcmask 130048   ;;  %s39_s0 = inlined_call_operand.vmem [shape: f32[32], index: 0, kind: input, shape index: {}]   ;;  %s40_s1 = inlined_call_operand.vmem [shape: f32[2,16], index: 1, kind: output, shape index: {}]  }
   0x1   :  { %v4_v0 = vld [vmem:[%s39_s0] sm:$0x1]  ;;  %s22_s0 = smov 112  }
   0x2   :  { %5 = vst [vmem:[#allocation1] sm:$0x1] %v4_v0 }
   0x9   :  { %v9_v1 = vld [vmem:[#allocation1] sm:$0x1]  }
   0xa   :  { %v6_v2 = vld [vmem:[#allocation1] sm:$0x1]   ;;  %10 = vrot.lane.b32.xlu0 %v9_v1, %s22_s0 }
   0xb   :  { %8 = vst.msk [vmem:[#allocation0] sm:$0x1] %vm7_vm0, %v6_v2  }
  0x7c   :  { %v11_v3 = vpop.permute.xlu0 %10  }
  0x7d   :  { %14 = vst.msk [vmem:[#allocation0 + $0x1] sm:$0x1] %vm7_vm0, %v11_v3  }
  0x84   :  { %v18_v4 = vld [vmem:[#allocation0] sm:$0x3] }
  0x85   :  { %20 = vst [vmem:[%s40_s1] sm:$0x3] %v18_v4 }

// kernel: squeeze.3
= control target key start
LH: loop header
LB: loop body
LE: loop exit
PB: predicated region body
PF: predicated region fallthrough
CT: control target
= control target key end

     0   :  { %s85_s0 = inlined_call_operand.vmem [shape: f32[32], index: 0, kind: input, shape index: {}]   ;;  %s86_s1 = inlined_call_operand.hbm [shape: f32[2,16,1], index: 1, kind: output, shape index: {}]  }
   0x1   :  { %v5_v0 = vld [vmem:[%s85_s0] sm:$0x1] }
   0x2   :  { %2 = vsyncpa [#allocation1], 0  ;;  %6 = vst [vmem:[#allocation3] sm:$0x1] %v5_v0  ;;  %vm8_vm0 = vcmask 130048   ;;  %s58_s0 = smov 112  }
   0x3   :  { %s59_s8 = smov [#allocation0]  }
   0x4   :  { %s26_s9 = sshll.u32 %s59_s8, 4  ;;  %s27_s9 = int_to_ptr.vmem [resolvable:$true] %s26_s9 }
   0x5   :  { %s34_s10 = scalar_lea.vmem %s27_s9, 32  ;;  %p39_p1 = scmp.lt.s32.totalorder %s27_s9, %s27_s9 }
   0x6   :  { %p35_p0 = scmp.ne.s32.totalorder %s27_s9, %s34_s10  ;;  %p40_p2 = scmp.lt.s32.totalorder %s34_s10, %s34_s10 }
   0x8   :  { %p41_p3 = por %p40_p2, %p39_p1 }
   0x9   :  { %v10_v1 = vld [vmem:[#allocation3] sm:$0x1]  }
   0xa   :  { %v7_v2 = vld [vmem:[#allocation3] sm:$0x1]   ;;  %11 = vrot.lane.b32.xlu0 %v10_v1, %s58_s0  ;;  %p42_p4 = pnand %p41_p3, %p35_p0 }
   0xb   :  { %9 = vst.msk [vmem:[#allocation2] sm:$0x1] %vm8_vm0, %v7_v2  }
  0x7c   :  { %v12_v3 = vpop.permute.xlu0 %11  }
  0x7d   :  { %15 = vst.msk [vmem:[#allocation2 + $0x1] sm:$0x1] %vm8_vm0, %v12_v3  }
  0x84   :  { %v19_v4 = vld [vmem:[#allocation2] sm:$0x3] }
  0x85   :  { %21 = vst [vmem:[#allocation0] sm:$0x3] %v19_v4 }
  0x86   :  { %45 = shalt.err (!%p42_p4)
}
  0x87   :  { %s46_s13 = scalar_lea.hbm %s86_s1, 32 }
  0x88   :  { %p47_p5 = scmp.ne.s32.totalorder %s86_s1, %s46_s13  ;;  %p50_p6 = scmp.lt.u32.totalorder %s46_s13, %s86_s1 }
  0x8a   :  { %p52_p7 = pnand %p50_p6, %p47_p5 }
  0x8c   :  { %55 = shalt.err (!%p52_p7)
}
  0x8d   :  { %29 = dma.vmem_to_hbm [thread:$0]  %s27_s9, 32, %s86_s1, [#allocation1]  }
  0x8e   :  { %56 = dma.done.wait [#allocation1], 32  }
  0x8f   :  { %57 = vsyncadd [#allocation1], 4294967264 }
  0x90   :  { %31 = vsyncpa [#allocation1], 1 }

// kernel: generator_device.2
= control target key start
LH: loop header
LB: loop body
LE: loop exit
PB: predicated region body
PF: predicated region fallthrough
CT: control target
= control target key end

     0   :  { %vm58_vm0 = vcmask 130048   ;;  %v671_v3 = vmov 0   ;;  %vm267_vm1 = vcmask 261120   ;;  %vm526_vm2 = vcmask 254976   ;;  %s860_s0 = inlined_call_operand.vmem [shape: f32[16,32], index: 0, kind: input, shape index: {}]   ;;  %s861_s3 = inlined_call_operand.vmem [shape: f32[16,16], index: 3, kind: input, shape index: {}]   ;;  %s862_s1 = inlined_call_operand.vmem [shape: f32[32,32], index: 1, kind: input, shape index: {}]   ;;  %s863_s4 = inlined_call_operand.vmem [shape: f32[16,1], index: 4, kind: input, shape index: {}]   ;;  %s864_s8 = inlined_call_operand.vmem [shape: f32[32,1], index: 8, kind: input, shape index: {}]   ;;  %s865_s7 = inlined_call_operand.vmem [shape: f32[32,32], index: 7, kind: input, shape index: {}]   ;;  %s866_s10 = inlined_call_operand.vmem [shape: f32[32,1], index: 10, kind: input, shape index: {}]   ;;  %s867_s6 = inlined_call_operand.vmem [shape: f32[16,1], index: 6, kind: input, shape index: {}]   ;;  %s868_s5 = inlined_call_operand.vmem [shape: f32[16,16], index: 5, kind: input, shape index: {}]   ;;  %s869_s9 = inlined_call_operand.vmem [shape: f32[32,32], index: 9, kind: input, shape index: {}]   ;;  %s870_s2 = inlined_call_operand.vmem [shape: f32[2,32], index: 2, kind: input, shape index: {}]   ;;  %s871_s11 = inlined_call_operand.vmem [shape: f32[2,32], index: 11, kind: output, shape index: {}]  }
   0x1   :  { %v38_v0 = vld [vmem:[%s860_s0] sm:$0xff]  ;;  %v39_v1 = vld [vmem:[%s860_s0 + $0x8] sm:$0xff]  ;;  %667 = vset.pattern.permute.xlu0 %v671_v3  ;;  %668 = vset.pattern.permute.xlu1 %v671_v3  ;;  %v42_v8 = vld [vmem:[%s862_s1 + $0x10] sm:$0xff]  ;;  %vm556_vm3 = vcmask 253952  }
   0x2   :  { %v44_v2 = vld [vmem:[%s861_s3] sm:$0xff]  ;;  %v641_v4 = vpack.c.bf16 %v39_v1, %v38_v0  ;;  %v41_v6 = vld [vmem:[%s862_s1 + $0x8] sm:$0xff]  ;;  %v43_v9 = vld [vmem:[%s862_s1 + $0x18] sm:$0xff] }
   0x3   :  { %603 = vmatprep.mubr.msk.f32.mxu0 %vm58_vm0, %v44_v2  ;;  %v40_v5 = vld [vmem:[%s862_s1] sm:$0xff]  ;;  %v45_v10 = vld [vmem:[%s861_s3 + $0x8] sm:$0xff]  ;;  %v653_v13 = vpack.c.bf16 %v43_v9, %v42_v8  ;;  %v245_v17 = vld [vmem:[%s864_s8 + $0x10] sm:$0xff] }
   0x4   :  { %v649_v7 = vpack.c.bf16 %v41_v6, %v40_v5  ;;  %642 = vmatprep.subr.bf16.mxu0 %v641_v4  ;;  %v46_v11 = vld [vmem:[%s863_s4] sm:$0xff]  ;;  %v47_v15 = vld [vmem:[%s863_s4 + $0x8] sm:$0xff]  ;;  %v246_v18 = vld [vmem:[%s864_s8 + $0x18] sm:$0xff] }
   0x5   :  { %644 = vmatpush3.bf16.msra.mxu0 %v641_v4  ;;  %v243_v12 = vld [vmem:[%s864_s8] sm:$0xff]  ;;  %50 = vperm.xlu0 %667, %v46_v11   ;;  %v244_v16 = vld [vmem:[%s864_s8 + $0x8] sm:$0xff]  ;;  %v241_v20 = vld [vmem:[%s865_s7 + $0x10] sm:$0xff] }
   0x6   :  { %650 = vmatprep.subr.bf16.mxu0 %v649_v7  ;;  %v239_v14 = vld [vmem:[%s865_s7] sm:$0xff]  ;;  %249 = vperm.xlu1 %668, %v243_v12   ;;  %v240_v19 = vld [vmem:[%s865_s7 + $0x8] sm:$0xff]  ;;  %v242_v23 = vld [vmem:[%s865_s7 + $0x18] sm:$0xff] }
   0x7   :  { %v373_v21 = vld [vmem:[%s866_s10] sm:$0xff]  ;;  %v374_v22 = vld [vmem:[%s866_s10 + $0x8] sm:$0xff]  ;;  %v375_v24 = vld [vmem:[%s866_s10 + $0x10] sm:$0xff] }
   0x8   :  { %604 = vmatmul.mubr.msk.f32.vlgmr.msra.gmra.mrb[0].mxu0 %vm58_vm0, %v45_v10  ;;  %v144_v25 = vld [vmem:[%s867_s6] sm:$0xff]  ;;  %v145_v26 = vld [vmem:[%s867_s6 + $0x8] sm:$0xff]  ;;  %v376_v27 = vld [vmem:[%s866_s10 + $0x18] sm:$0xff] }
   0x9   :  { %652 = vmatpush3.bf16.msra.mxu0 %v649_v7  ;;  %621 = vmatprep.mubr.msk.f32.mxu0 %vm267_vm1, %v239_v14  ;;  %v142_v28 = vld [vmem:[%s868_s5] sm:$0xff]  ;;  %v143_v43 = vld [vmem:[%s868_s5 + $0x8] sm:$0xff]  ;;  %v371_v59 = vld [vmem:[%s869_s9 + $0x10] sm:$0xff] }
   0xa   :  { %654 = vmatprep.subr.bf16.mxu0 %v653_v13  ;;  %55 = vperm.xlu0 %667, %v47_v15   ;;  %v369_v45 = vld [vmem:[%s869_s9] sm:$0xff]  ;;  %v370_v58 = vld [vmem:[%s869_s9 + $0x8] sm:$0xff]  ;;  %v372_v60 = vld [vmem:[%s869_s9 + $0x18] sm:$0xff] }
   0xb   :  { %254 = vperm.xlu1 %668, %v244_v16   ;;  %610 = vmatprep.mubr.msk.f32.mxu1 %vm58_vm0, %v142_v28  ;;  %v838_v61 = vld [vmem:[%s870_s2] sm:$0x3] }
   0xc   :  { %v527_v62 = vsel %vm526_vm2, %v838_v61, 0.0 }
   0xd   :  { %656 = vmatpush3.bf16.msra.mxu0 %v653_v13 }
   0xe   :  { %259 = vperm.xlu0 %667, %v245_v17  }
   0xf   :  { %264 = vperm.xlu1 %668, %v246_v18  }
  0x10   :  { %622 = vmatmul.mubr.msk.f32.vlgmr.msra.gmra.mrb[2].mxu0 %vm267_vm1, %v240_v19 }
  0x11   :  { %624 = vmatprep.mubr.msk.f32.mxu0 %vm267_vm1, %v241_v20 }
  0x12   :  { %379 = vperm.xlu0 %667, %v373_v21  }
  0x13   :  { %384 = vperm.xlu1 %668, %v374_v22  }
  0x14   :  { %625 = vmatmul.mubr.msk.f32.gmra.mrb[4].mxu0 %vm267_vm1, %v242_v23 }
  0x16   :  { %389 = vperm.xlu0 %667, %v375_v24  }
  0x17   :  { %148 = vperm.xlu1 %668, %v144_v25  }
  0x1a   :  { %153 = vperm.xlu0 %667, %v145_v26  }
  0x1b   :  { %394 = vperm.xlu1 %668, %v376_v27  }
  0x39   :  { %535 = vadd.xlane.f32.xlu0 %v527_v62 }
  0x84   :  { %v51_v29 = vpop.permute.xlu0 %50 }
  0x85   :  { %v250_v30 = vpop.permute.xlu1 %249 }
  0x89   :  { %v56_v31 = vpop.permute.xlu0 %55 }
  0x8a   :  { %v255_v38 = vpop.permute.xlu1 %254 }
  0x8d   :  { %v260_v50 = vpop.permute.xlu0 %259 }
  0x8e   :  { %v265_v47 = vpop.permute.xlu1 %264 }
  0x91   :  { %v380_v63 = vpop.permute.xlu0 %379 }
  0x92   :  { %v385_v1 = vpop.permute.xlu1 %384 }
  0x95   :  { %v390_v0 = vpop.permute.xlu0 %389 }
  0x96   :  { %v149_v4 = vpop.permute.xlu1 %148 }
  0x99   :  { %v154_v2 = vpop.permute.xlu0 %153 }
  0x9a   :  { %v395_v19 = vpop.permute.xlu1 %394 }
  0xdb   :  { %v605_v32 = vpop.f32.mrb[0].mxu0 }
  0xdc   :  { %v137_v33 = vadd.f32 %v605_v32, %v56_v31  ;;  %v131_v34 = vpop.f32.mrb[1].mxu0 }
  0xdd   :  { %v132_v35 = vadd.f32 %v131_v34, %v51_v29  ;;  %v528_v29 = vrot.slane %v527_v62, 4 }
  0xde   :  { %v141_v36 = vmax.f32 %v137_v33, 0.0 }
  0xdf   :  { %v140_v37 = vmax.f32 %v132_v35, 0.0  ;;  %v529_v35 = vadd.f32 %v528_v29, %v527_v62 }
  0xe1   :  { %v645_v39 = vpack.c.bf16 %v141_v36, %v140_v37 }
  0xe3   :  { %646 = vmatprep.subr.bf16.mxu1 %v645_v39  ;;  %v623_v40 = vpop.f32.mrb[2].mxu0 }
  0xe4   :  { %v352_v41 = vadd.f32 %v623_v40, %v255_v38  ;;  %648 = vmatpush3.bf16.msra.mxu1 %v645_v39  ;;  %v346_v42 = vpop.f32.mrb[3].mxu0  ;;  %v530_v40 = vrot.slane %v529_v35, 2 }
  0xe5   :  { %v347_v44 = vadd.f32 %v346_v42, %v250_v30 }
  0xe6   :  { %v366_v46 = vmax.f32 %v352_v41, 0.0 }
  0xe7   :  { %v365_v48 = vmax.f32 %v347_v44, 0.0  ;;  %611 = vmatmul.mubr.msk.f32.vlgmr.msra.gmra.mrb[0].mxu1 %vm58_vm0, %v143_v43  ;;  %v626_v49 = vpop.f32.mrb[4].mxu0  ;;  %v531_v44 = vadd.f32 %v530_v40, %v529_v35 }
  0xe8   :  { %v362_v51 = vadd.f32 %v626_v49, %v265_v47  ;;  %v356_v52 = vpop.f32.mrb[5].mxu0  ;;  %635 = vmatprep.mubr.msk.f32.mxu1 %vm267_vm1, %v369_v45 }
  0xe9   :  { %v657_v53 = vpack.c.bf16 %v366_v46, %v365_v48  ;;  %v357_v54 = vadd.f32 %v356_v52, %v260_v50  ;;  %v532_v46 = vrot.slane %v531_v44, 1 }
  0xea   :  { %v368_v55 = vmax.f32 %v362_v51, 0.0 }
  0xeb   :  { %v367_v56 = vmax.f32 %v357_v54, 0.0  ;;  %658 = vmatprep.subr.bf16.mxu1 %v657_v53  ;;  %v533_v52 = vadd.f32 %v532_v46, %v531_v44 }
  0xec   :  { %660 = vmatpush3.bf16.msra.mxu1 %v657_v53 }
  0xed   :  { %v661_v57 = vpack.c.bf16 %v368_v55, %v367_v56  ;;  %vm552_vm4 = vcmp.gt.f32.partialorder %v533_v52, 0.5 }
  0xef   :  { %662 = vmatprep.subr.bf16.mxu1 %v661_v57 }
  0xf0   :  { %664 = vmatpush3.bf16.msra.mxu1 %v661_v57  ;;  %v536_v57 = vpop.xlane.xlu0 %535 }
  0xf3   :  { %636 = vmatmul.mubr.msk.f32.vlgmr.msra.gmra.mrb[2].mxu1 %vm267_vm1, %v370_v58  ;;  %v541_v58 = vmax.f32 %v536_v57, 1.0 }
  0xf4   :  { %638 = vmatprep.mubr.msk.f32.mxu1 %vm267_vm1, %v371_v59 }
  0xf5   :  { %669 = vrcp.f32 %v541_v58 }
  0xf7   :  { %639 = vmatmul.mubr.msk.f32.gmra.mrb[4].mxu1 %vm267_vm1, %v372_v60 }
  0xff   :  { %v670_v59 = vpop.eup %669 }
 0x1ba   :  { %v612_v3 = vpop.f32.mrb[0].mxu1 }
 0x1bb   :  { %v234_v5 = vadd.f32 %v612_v3, %v154_v2  ;;  %v228_v6 = vpop.f32.mrb[1].mxu1 }
 0x1bc   :  { %v229_v7 = vadd.f32 %v228_v6, %v149_v4 }
 0x1bd   :  { %v238_v8 = vmax.f32 %v234_v5, 0.0 }
 0x1be   :  { %v237_v9 = vmax.f32 %v229_v7, 0.0  ;;  %v672_v7 = vmov 0.0  }
 0x1bf   :  { %v499_v10 = vsel %vm267_vm1, %v238_v8, 0.0 }
 0x1c0   :  { %v498_v11 = vsel %vm267_vm1, %v237_v9, 0.0 }
 0x1c1   :  { %v500_v12 = vadd.f32 %v499_v10, %v498_v11 }
 0x1c3   :  { %v501_v17 = vrot.slane %v500_v12, 4 }
 0x1c5   :  { %v502_v27 = vadd.f32 %v501_v17, %v500_v12 }
 0x1c6   :  { %v637_v13 = vpop.f32.mrb[2].mxu1 }
 0x1c7   :  { %v481_v14 = vadd.f32 %v637_v13, %v385_v1  ;;  %v475_v15 = vpop.f32.mrb[3].mxu1  ;;  %v503_v33 = vrot.slane %v502_v27, 2 }
 0x1c8   :  { %v476_v16 = vadd.f32 %v475_v15, %v380_v63 }
 0x1c9   :  { %v495_v18 = vmax.f32 %v481_v14, 0.0  ;;  %v504_v38 = vadd.f32 %v503_v33, %v502_v27 }
 0x1ca   :  { %v494_v20 = vmax.f32 %v476_v16, 0.0  ;;  %v640_v21 = vpop.f32.mrb[4].mxu1 }
 0x1cb   :  { %v510_v22 = vsel %vm267_vm1, %v495_v18, 0.0  ;;  %v491_v23 = vadd.f32 %v640_v21, %v395_v19  ;;  %v485_v24 = vpop.f32.mrb[5].mxu1  ;;  %v505_v42 = vrot.slane %v504_v38, 1 }
 0x1cc   :  { %v509_v25 = vsel %vm267_vm1, %v494_v20, 0.0  ;;  %v486_v26 = vadd.f32 %v485_v24, %v390_v0 }
 0x1cd   :  { %v511_v28 = vadd.f32 %v510_v22, %v509_v25  ;;  %v497_v30 = vmax.f32 %v491_v23, 0.0  ;;  %v506_v47 = vadd.f32 %v505_v42, %v504_v38 }
 0x1ce   :  { %v496_v31 = vmax.f32 %v486_v26, 0.0 }
 0x1cf   :  { %v514_v36 = vsel %vm267_vm1, %v497_v30, 0.0  ;;  %v508_v50 = vmul.f32 0.0625, %v506_v47 }
 0x1d0   :  { %v512_v32 = vsel %vm267_vm1, %v496_v31, 0.0 }
 0x1d1   :  { %v513_v34 = vadd.f32 %v512_v32, %v511_v28 }
 0x1d3   :  { %v515_v37 = vadd.f32 %v514_v36, %v513_v34 }
 0x1d5   :  { %v516_v39 = vrot.slane %v515_v37, 4 }
 0x1d7   :  { %v517_v41 = vadd.f32 %v516_v39, %v515_v37 }
 0x1d9   :  { %v518_v43 = vrot.slane %v517_v41, 2 }
 0x1db   :  { %v519_v45 = vadd.f32 %v518_v43, %v517_v41 }
 0x1dd   :  { %v520_v48 = vrot.slane %v519_v45, 1 }
 0x1df   :  { %v521_v49 = vadd.f32 %v520_v48, %v519_v45 }
 0x1e1   :  { %v523_v51 = vmul.f32 0.03125, %v521_v49 }
 0x1e3   :  { %v524_v53 = vmul.f32 %v523_v51, %v508_v50 }
 0x1e5   :  { %v534_v54 = vmul.f32 %v533_v52, %v524_v53 }
 0x1e7   :  { %v537_v55 = vmul.f32 %v534_v54, %v838_v61  ;;  %557 = vst.msk [vmem:[%s871_s11] sm:$0x1] %vm556_vm3, %v534_v54 }
 0x1e9   :  { %v538_v56 = vsel %vm526_vm2, %v537_v55, 0.0 }
 0x1ea   :  { %539 = vadd.xlane.f32.xlu1 %v538_v56 }
 0x277   :  { %v540_v60 = vpop.xlane.xlu1 %539 }
 0x278   :  { %v543_v62 = vmul.f32 %v670_v59, %v540_v60 }
 0x27a   :  { %v544_v63 = vmul.f32 %v543_v62, %v838_v61 }
 0x27c   :  { %v545_v0 = vsel %vm526_vm2, %v544_v63, 0.0 }
 0x27d   :  { %v546_v1 = vrot.slane %v545_v0, 4 }
 0x27f   :  { %v547_v2 = vadd.f32 %v546_v1, %v545_v0 }
 0x281   :  { %v548_v3 = vrot.slane %v547_v2, 2 }
 0x283   :  { %v549_v4 = vadd.f32 %v548_v3, %v547_v2 }
 0x285   :  { %v550_v5 = vrot.slane %v549_v4, 1 }
 0x287   :  { %v551_v6 = vadd.f32 %v550_v5, %v549_v4 }
 0x289   :  { %vm553_vm5 = vcmp.ge.f32.partialorder %v524_v53, %v551_v6 }
 0x28a   :  { %vm554_vm6 = vmand %vm552_vm4, %vm553_vm5 }
 0x28b   :  { %v555_v8 = vsel %vm554_vm6, 1.0, %v672_v7 }
 0x28c   :  { %558 = vst.msk [vmem:[%s871_s11 + $0x1] sm:$0x1] %vm556_vm3, %v555_v8 }

// kernel: generator_device.3
= control target key start
LH: loop header
LB: loop body
LE: loop exit
PB: predicated region body
PF: predicated region fallthrough
CT: control target
= control target key end

     0   :  { %s1756_s0 = inlined_call_operand.vmem [shape: f32[2,16,16], index: 0, kind: input, shape index: {}]   ;;  %s1757_s1 = inlined_call_operand.vmem [shape: f32[2,16,32], index: 1, kind: input, shape index: {}]   ;;  %s1758_s2 = inlined_call_operand.vmem [shape: f32[16,16], index: 2, kind: input, shape index: {}]   ;;  %s1759_s3 = inlined_call_operand.vmem [shape: f32[16,32], index: 3, kind: input, shape index: {}]   ;;  %s1760_s4 = inlined_call_operand.vmem [shape: f32[16,16], index: 4, kind: input, shape index: {}]   ;;  %s1761_s5 = inlined_call_operand.vmem [shape: f32[1,16], index: 5, kind: input, shape index: {}]   ;;  %s1762_s6 = inlined_call_operand.vmem [shape: f32[16,16], index: 6, kind: input, shape index: {}]   ;;  %s1763_s7 = inlined_call_operand.vmem [shape: f32[1,16], index: 7, kind: input, shape index: {}]   ;;  %s1764_s8 = inlined_call_operand.vmem [shape: f32[32,32], index: 8, kind: input, shape index: {}]   ;;  %s1765_s9 = inlined_call_operand.vmem [shape: f32[1,32], index: 9, kind: input, shape index: {}]   ;;  %s1766_s10 = inlined_call_operand.vmem [shape: f32[32,32], index: 10, kind: input, shape index: {}]   ;;  %s1767_s11 = inlined_call_operand.vmem [shape: f32[1,32], index: 11, kind: input, shape index: {}]   ;;  %s1768_s12 = inlined_call_operand.vmem [shape: f32[2,16,16], index: 12, kind: input, shape index: {}]   ;;  %s1769_s13 = inlined_call_operand.vmem [shape: f32[2,16,32], index: 13, kind: input, shape index: {}]   ;;  %s1770_s14 = inlined_call_operand.hbm [shape: f32[2,16,16], index: 14, kind: output, shape index: {0}]   ;;  %s1771_s15 = inlined_call_operand.hbm [shape: f32[2,16,32], index: 15, kind: output, shape index: {1}]  }
   0x1   :  { %1780 = sst [smem:[#allocation14_spill]] %s1760_s4 }
   0x2   :  { %21 = vsyncpa [#allocation3], 0 }
   0x3   :  { %23 = vsyncpa [#allocation3 + $0x1], 0 }
   0x4   :  { %24 = vsyncpa [#allocation5], 0 }
   0x5   :  { %26 = vsyncpa [#allocation5 + $0x1], 0  ;;  %s1515_s18 = smov 0   ;;  %s1517_s19 = smov 0  }
   0x6   :  { %s1519_s20 = smov 0   ;;  %s1521_s21 = smov 0  }
   0x7 LB: > { %1781 = sst [smem:[#allocation8_spill]] %s1416_s18  ;;  %s1536_s22 = sadd.s32 4294967295, %s1428_s21   ;;  %s1428_s21 = sphi %s1521_s21, %s1795_s21   ;;  %s1424_s20 = sphi %s1519_s20, %s1797_s20   ;;  %s1420_s19 = sphi %s1517_s19, %s1799_s19   ;;  %s1416_s18 = sphi %s1515_s18, %s1798_s18  }
   0x8   : > { %1782 = sst [smem:[#allocation9_spill]] %s1424_s20  ;;  %s1167_s23 = sadd.s32 4294967294, %s1428_s21  }
   0x9   : > { %1783 = sst [smem:[#allocation10_spill]] %s1428_s21  ;;  %s1540_s24 = sadd.s32 1, %s1428_s21  }
   0xa   : > { %1784 = sst [smem:[#allocation11_spill]] %s1540_s24  ;;  %s353_s25 = sadd.s32 1, %s1424_s20 }
   0xb   : > { %s350_s26 = ssub.s32 %s1428_s21, %s1540_s24  ;;  %p363_p0 = scmp.ne.s32.totalorder %s1424_s20, %s1420_s19 }
   0xc   : > { %p351_p1 = scmp.eq.s32.totalorder %s350_s26, 0  ;;  %p364_p2 = scmp.eq.s32.totalorder %s1536_s22, 1 }
   0xd   : > { %p369_p3 = scmp.ne.s32.totalorder %s1420_s19, %s1416_s18  ;;  %p370_p4 = scmp.eq.s32.totalorder %s1167_s23, 1 }
   0xe   : > { %s1551_s27 = scalar_select %p351_p1, %s1424_s20, %s353_s25  }
   0xf   : > { %p1553_p5 = por %p364_p2, %p363_p0  ;;  %p1557_p6 = por %p370_p4, %p369_p3 }
  0x10   : > { %1785 = sst [smem:[#allocation12_spill]] %s1551_s27  ;;  %p1170_p7 = scmp.ge.s32.totalorder %s1428_s21, 1 }
  0x11   : > { %s1787_s29 = scalar_select %p1557_p6, 1, 0 }
  0x12   : > { %p476_p8 = scmp.lt.s32.totalorder %s1428_s21, 3 }
  0x13   : > { %1788 = sst [smem:[#allocation13_spill]] %s1787_s29 }
  0x14   : > { %p477_p9 = pnand %p1170_p7, %p476_p8 }
  0x15   : > { %s1789_s4 = sld [smem:[#allocation14_spill]] (!%p477_p9)  ;;  %p544_p10 = scmp.lt.s32.totalorder (!%p477_p9), %s1536_s22, 1  ;;  %v807_v3 = vld [vmem:[%s1764_s8] sm:$0xff] (!%p477_p9)  ;;  %v808_v4 = vld [vmem:[%s1764_s8 + $0x8] sm:$0xff] (!%p477_p9)  ;;  %v809_v9 = vld [vmem:[%s1764_s8 + $0x10] sm:$0xff] (!%p477_p9)  ;;  %vm579_vm0 = vcmask (!%p477_p9), 130048  }
  0x16   : > { %480 = sbr.rel (%p477_p9) target bundleno = 627 (0x273), region = 76  ;;  %v1271_v5 = vpack.c.bf16 (!%p477_p9), %v808_v4, %v807_v3  ;;  %v566_v6 = vld [vmem:[%s1758_s2] sm:$0xff] (!%p477_p9)  ;;  %v567_v7 = vld [vmem:[%s1758_s2 + $0x8] sm:$0xff] (!%p477_p9)  ;;  %v810_v10 = vld [vmem:[%s1764_s8 + $0x18] sm:$0xff] (!%p477_p9)  ;;  %vm818_vm1 = vcmask (!%p477_p9), 261120   ;;  %s1644_s29 = sand.u32 (!%p477_p9), 1, %s1420_s19  }
  0x17   : > { %v803_v8 = vld [vmem:[%s1759_s3] sm:$0xff] (!%p477_p9)  ;;  %v1275_v17 = vpack.c.bf16 (!%p477_p9), %v810_v10, %v809_v9  ;;  %v804_v19 = vld [vmem:[%s1759_s3 + $0x8] sm:$0xff] (!%p477_p9)  ;;  %v904_v32 = vld [vmem:[%s1766_s10 + $0x10] sm:$0xff] (!%p477_p9)  ;;  %s1779_s26 = sshll.u32 (!%p477_p9), %s1536_s22, 8  ;;  %s1008_s17 = scalar_lea.sflag (!%p477_p9), [#allocation5], %s1644_s29 }
  0x18   : > { %v663_v21 = vld [vmem:[%s1762_s6] sm:$0xff] (!%p477_p9)  ;;  %v664_v22 = vld [vmem:[%s1762_s6 + $0x8] sm:$0xff] (!%p477_p9)  ;;  %v905_v33 = vld [vmem:[%s1766_s10 + $0x18] sm:$0xff] (!%p477_p9)  ;;  %s1430_s25 = smov (!%p477_p9), [#allocation4]  }
  0x19   : > { %v1267_v23 = vpack.c.bf16 (!%p477_p9), %v664_v22, %v663_v21  ;;  %v902_v24 = vld [vmem:[%s1766_s10] sm:$0xff] (!%p477_p9)  ;;  %v903_v25 = vld [vmem:[%s1766_s10 + $0x8] sm:$0xff] (!%p477_p9)  ;;  %v1283_v36 = vpack.c.bf16 (!%p477_p9), %v905_v33, %v904_v32 }
  0x1a   : > { %v1279_v26 = vpack.c.bf16 (!%p477_p9), %v903_v25, %v902_v24  ;;  %v1181_v27 = vld [vmem:[%s1761_s5] ss:$0 sm:$0xff] (!%p477_p9) }
  0x1b   : > { %v570_v0 = vld [vmem:[%s1789_s4] sm:$0xff] (!%p477_p9)  ;;  %v571_v1 = vld [vmem:[%s1789_s4 + $0x8] sm:$0xff] (!%p477_p9)  ;;  %1268 = vmatprep.subr.bf16.mxu1 (!%p477_p9), %v1267_v23 }
  0x1c   : > { %v1263_v2 = vpack.c.bf16 (!%p477_p9), %v571_v1, %v570_v0  ;;  %1270 = vmatpush3.bf16.msra.mxu1 (!%p477_p9), %v1267_v23  ;;  %v1187_v37 = vld [vmem:[%s1765_s9] ss:$0 sm:$0xff] (!%p477_p9) }
  0x1d   : > { %s545_s24 = scalar_select %p544_p10, %s1536_s22, 1  ;;  %1280 = vmatprep.subr.bf16.mxu1 %v1279_v26  ;;  %v1184_v44 = vld [vmem:[%s1763_s7] ss:$0 sm:$0xff] }
  0x1e   : > { %1264 = vmatprep.subr.bf16.mxu0 %v1263_v2  ;;  %v1190_v52 = vld [vmem:[%s1767_s11] ss:$0 sm:$0xff] }
  0x1f   : > { %1266 = vmatpush3.bf16.msra.mxu0 %v1263_v2  ;;  %s1577_s30 = sshll.u32 %s545_s24, 4  ;;  %s1664_s24 = scalar_lea.hbm %s1771_s15, %s1779_s26 }
  0x20   : > { %s548_s4 = scalar_lea.vmem %s1756_s0, %s1577_s30  ;;  %1272 = vmatprep.subr.bf16.mxu0 %v1271_v5  ;;  %s553_s23 = scalar_lea.vmem %s1757_s1, %s1577_s30 }
  0x21   : > { %v564_v11 = vld [vmem:[%s548_s4] sm:$0xff]  ;;  %v565_v12 = vld [vmem:[%s548_s4 + $0x8] sm:$0xff]  ;;  %s563_s4 = scalar_lea.vmem %s1769_s13, %s1577_s30 }
  0x22   : > { %v801_v13 = vld [vmem:[%s553_s23] sm:$0xff]  ;;  %v568_v14 = vmul.f32 %v566_v6, %v564_v11  ;;  %v569_v15 = vmul.f32 %v567_v7, %v565_v12  ;;  %v802_v18 = vld [vmem:[%s553_s23 + $0x8] sm:$0xff]  ;;  %s1778_s23 = sshll.u32 %s1644_s29, 4 }
  0x23   : > { %v805_v16 = vmul.f32 %v803_v8, %v801_v13  ;;  %v806_v20 = vmul.f32 %v804_v19, %v802_v18  ;;  %v997_v58 = vld [vmem:[%s563_s4 + $0x8] sm:$0xff]  ;;  %v996_v59 = vld [vmem:[%s563_s4] sm:$0xff]  ;;  %s543_s21 = scalar_lea.vmem [#allocation4], %s1778_s23  ;;  %s1338_s4 = sshll.u32 %s1430_s25, 4  ;;  %s1339_s4 = int_to_ptr.vmem [resolvable:$false] %s1338_s4 }
  0x24   : > { %1231 = vmatprep.mubr.msk.f32.mxu0 %vm579_vm0, %v568_v14  ;;  %s1037_s16 = sshll.u32 %s543_s21, 4  ;;  %s1340_s23 = scalar_lea.vmem %s1339_s4, 512  ;;  %s1666_s16 = int_to_ptr.vmem [resolvable:$true] %s1037_s16 }
  0x25   : > { %1232 = vmatmul.mubr.msk.f32.vlgmr.msra.gmra.mrb[0].mxu0 %vm579_vm0, %v569_v15  ;;  %s1334_s18 = scalar_lea.vmem %s1666_s16, 256  ;;  %p1341_p0 = scmp.lt.s32.totalorder %s1666_s16, %s1339_s4 }
  0x26   : > { %1274 = vmatpush3.bf16.msra.mxu0 %v1271_v5  ;;  %1249 = vmatprep.mubr.msk.f32.mxu0 %vm818_vm1, %v805_v16  ;;  %p1335_p11 = scmp.ne.s32.totalorder %s1666_s16, %s1334_s18  ;;  %p1342_p1 = scmp.lt.s32.totalorder %s1340_s23, %s1334_s18 }
  0x27   : > { %1276 = vmatprep.subr.bf16.mxu0 %v1275_v17 }
  0x28   : > { %p1336_p12 = pnand %p1335_p11, %p1553_p5  ;;  %p1343_p2 = por %p1342_p1, %p1341_p0 }
  0x2a   : > { %1278 = vmatpush3.bf16.msra.mxu0 %v1275_v17  ;;  %p1337_p13 = pneg %p1336_p12 }
  0x2c   : > { %p1344_p3 = pnand %p1343_p2, %p1337_p13 }
  0x2d   : > { %1250 = vmatmul.mubr.msk.f32.vlgmr.msra.gmra.mrb[2].mxu0 %vm818_vm1, %v806_v20 }
  0xf8   : > { %v1233_v28 = vpop.f32.mrb[0].mxu0 }
  0xf9   : > { %v658_v29 = vadd.f32 %v1233_v28, %v1181_v27  ;;  %v652_v30 = vpop.f32.mrb[1].mxu0 }
  0xfa   : > { %v653_v31 = vadd.f32 %v1181_v27, %v652_v30 }
  0xfb   : > { %v662_v35 = vmax.f32 %v658_v29, 0.0 }
  0xfc   : > { %v661_v34 = vmax.f32 %v653_v31, 0.0 }
  0xfe   : > { %1238 = vmatprep.mubr.msk.f32.mxu1 %vm579_vm0, %v661_v34 }
  0xff   : > { %1239 = vmatmul.mubr.msk.f32.vlgmr.msra.gmra.mrb[0].mxu1 %vm579_vm0, %v662_v35 }
 0x100   : > { %v1251_v38 = vpop.f32.mrb[2].mxu0  ;;  %1282 = vmatpush3.bf16.msra.mxu1 %v1279_v26 }
 0x101   : > { %v897_v39 = vadd.f32 %v1251_v38, %v1187_v37  ;;  %v891_v40 = vpop.f32.mrb[3].mxu0  ;;  %1284 = vmatprep.subr.bf16.mxu1 %v1283_v36 }
 0x102   : > { %v892_v41 = vadd.f32 %v1187_v37, %v891_v40 }
 0x103   : > { %v901_v42 = vmax.f32 %v897_v39, 0.0 }
 0x104   : > { %v900_v43 = vmax.f32 %v892_v41, 0.0  ;;  %1286 = vmatpush3.bf16.msra.mxu1 %v1283_v36 }
 0x106   : > { %1260 = vmatprep.mubr.msk.f32.mxu1 %vm818_vm1, %v900_v43 }
 0x107   : > { %1261 = vmatmul.mubr.msk.f32.vlgmr.msra.gmra.mrb[2].mxu1 %vm818_vm1, %v901_v42 }
 0x1d2   : > { %v1240_v45 = vpop.f32.mrb[0].mxu1 }
 0x1d3   : > { %v744_v46 = vpop.f32.mrb[1].mxu1  ;;  %v1640_v48 = vadd.f32 %v1240_v45, %v1184_v44 }
 0x1d4   : > { %v745_v47 = vadd.f32 %v1184_v44, %v744_v46 }
 0x1d5   : > { %v754_v50 = vmax.f32 %v1640_v48, 0.0 }
 0x1d6   : > { %v753_v49 = vmax.f32 %v745_v47, 0.0 }
 0x1d8   : > { %755 = vxpose.xlu0.b32.start [1/2] (short) (narrow) %v753_v49, 16 }
 0x1da   : > { %v1262_v51 = vpop.f32.mrb[2].mxu1 }
 0x1db   : > { %v985_v53 = vpop.f32.mrb[3].mxu1  ;;  %v991_v54 = vadd.f32 %v1262_v51, %v1190_v52 }
 0x1dc   : > { %756 = vxpose.xlu0.b32.end [2/2] (short) (narrow) %v754_v50, 16  ;;  %v986_v55 = vadd.f32 %v1190_v52, %v985_v53 }
 0x1dd   : > { %v995_v56 = vmax.f32 %v991_v54, 0.0 }
 0x1de   : > { %v994_v57 = vmax.f32 %v986_v55, 0.0 }
 0x1df   : > { %v999_v60 = vmul.f32 %v997_v58, %v995_v56 }
 0x1e0   : > { %v998_v61 = vmul.f32 %v996_v59, %v994_v57 }
 0x1e1   : > { %1001 = vst.msk [vmem:[%s543_s21 + $0x8] sm:$0xff] %vm818_vm1, %v999_v60 }
 0x1e2   : > { %1000 = vst.msk [vmem:[%s543_s21] sm:$0xff] %vm818_vm1, %v998_v61 }
 0x1e3   : > { %1347 = shalt.err (!%p1344_p3)
}
 0x1e4   : > { %s1348_s21 = scalar_lea.hbm %s1664_s24, 256  ;;  %s1352_s25 = scalar_lea.hbm %s1771_s15, 512 }
 0x1e5   : > { %p1349_p4 = scmp.ne.s32.totalorder %s1664_s24, %s1348_s21  ;;  %p1353_p9 = scmp.lt.u32.totalorder %s1664_s24, %s1771_s15 }
 0x1e6   : > { %p1354_p10 = scmp.lt.u32.totalorder %s1352_s25, %s1348_s21  ;;  %p1356_p12 = scmp.lt.u32.totalorder %s1348_s21, %s1664_s24 }
 0x1e7   : > { %p1350_p7 = pnand %p1349_p4, %p1553_p5 }
 0x1e8   : > { %p1355_p11 = por %p1354_p10, %p1353_p9 }
 0x1e9   : > { %p1351_p8 = pneg %p1350_p7 }
 0x1ea   : > { %p1357_p13 = por %p1356_p12, %p1355_p11 }
 0x1ec   : > { %p1358_p0 = pnand %p1357_p13, %p1351_p8 }
 0x1ee   : > { %1361 = shalt.err (!%p1358_p0)
}
 0x1ef   : > { %s1431_s23 = smov 128   ;;  %s1432_s18 = smov 8   ;;  %v1433_v4 = vmov 0.0  }
 0x1f0   : > { %1288 = dma.vmem_to_hbm [thread:$0]  (%p1553_p5), %s1666_s16, 256, %s1664_s24, %s1008_s17, %s1431_s23, %s1431_s23, %s1432_s18  }
 0x1f1   : > { %s558_s20 = scalar_lea.vmem %s1768_s12, %s1577_s30  ;;  %s1790_s24 = sshll.u32 %s1644_s29, 4 }
 0x1f2   : > { %v795_v1 = vld [vmem:[%s558_s20] sm:$0xff]  ;;  %v796_v8 = vld [vmem:[%s558_s20 + $0x8] sm:$0xff]  ;;  %s536_s16 = scalar_lea.vmem [#allocation2], %s1790_s24  ;;  %s1791_s30 = sshll.u32 %s1536_s22, 8 }
 0x1f3   : > { %s1021_s17 = sshll.u32 %s536_s16, 4  ;;  %s1707_s4 = scalar_lea.hbm %s1770_s14, %s1791_s30  ;;  %s1709_s17 = int_to_ptr.vmem [resolvable:$true] %s1021_s17 }
 0x1f4   : > { %s1003_s26 = scalar_lea.sflag [#allocation3], %s1644_s29  ;;  %s1362_s21 = scalar_lea.vmem %s1709_s17, 256 }
 0x1f5   : > { %p1363_p1 = scmp.ne.s32.totalorder %s1709_s17, %s1362_s21  ;;  %s1434_s20 = smov [#allocation2]  }
 0x1f6   : > { %s1366_s22 = sshll.u32 %s1434_s20, 4  ;;  %s1367_s22 = int_to_ptr.vmem [resolvable:$false] %s1366_s22 }
 0x1f7   : > { %p1364_p2 = pnand %p1363_p1, %p1553_p5  ;;  %s1368_s24 = scalar_lea.vmem %s1367_s22, 512 }
 0x1f8   : > { %p1369_p4 = scmp.lt.s32.totalorder %s1709_s17, %s1367_s22  ;;  %p1370_p7 = scmp.lt.s32.totalorder %s1368_s24, %s1362_s21 }
 0x1f9   : > { %p1365_p3 = pneg %p1364_p2 }
 0x1fa   : > { %p1371_p8 = por %p1370_p7, %p1369_p4 }
 0x1fc   : > { %p1372_p9 = pnand %p1371_p8, %p1365_p3 }
 0x258   : > { %v771_v62 = vpop.trf.xlu0 }
 0x259   : > { %v787_v63 = vadd.f32 %v771_v62, %v753_v49 }
 0x25b   : > { %v789_v0 = vmul.f32 0.5, %v787_v63 }
 0x25c   : > { %v772_v2 = vpop.trf.xlu0 }
 0x25d   : > { %vm791_vm2 = vcmp.ge.f32.partialorder %v789_v0, 0.5  ;;  %v788_v3 = vadd.f32 %v772_v2, %v754_v50 }
 0x25e   : > { %v793_v5 = vsel %vm791_vm2, 1.0, %v1433_v4 }
 0x25f   : > { %v797_v6 = vmul.f32 %v795_v1, %v793_v5  ;;  %v790_v7 = vmul.f32 0.5, %v788_v3 }
 0x261   : > { %799 = vst.msk [vmem:[%s536_s16] sm:$0xff] %vm579_vm0, %v797_v6  ;;  %vm792_vm3 = vcmp.ge.f32.partialorder %v790_v7, 0.5 }
 0x262   : > { %v794_v9 = vsel %vm792_vm3, 1.0, %v1433_v4 }
 0x263   : > { %v798_v10 = vmul.f32 %v796_v8, %v794_v9 }
 0x265   : > { %800 = vst.msk [vmem:[%s536_s16 + $0x8] sm:$0xff] %vm579_vm0, %v798_v10 }
 0x266   : > { %1375 = shalt.err (!%p1372_p9)
}
 0x267   : > { %s1376_s16 = scalar_lea.hbm %s1707_s4, 256  ;;  %s1380_s25 = scalar_lea.hbm %s1770_s14, 512 }
 0x268   : > { %p1377_p10 = scmp.ne.s32.totalorder %s1707_s4, %s1376_s16  ;;  %p1381_p13 = scmp.lt.u32.totalorder %s1707_s4, %s1770_s14 }
 0x269   : > { %p1382_p0 = scmp.lt.u32.totalorder %s1380_s25, %s1376_s16  ;;  %p1384_p2 = scmp.lt.u32.totalorder %s1376_s16, %s1707_s4 }
 0x26a   : > { %p1378_p11 = pnand %p1377_p10, %p1553_p5 }
 0x26b   : > { %p1383_p1 = por %p1382_p0, %p1381_p13 }
 0x26c   : > { %p1379_p12 = pneg %p1378_p11 }
 0x26d   : > { %p1385_p3 = por %p1384_p2, %p1383_p1 }
 0x26f   : > { %p1386_p4 = pnand %p1385_p3, %p1379_p12 }
 0x271   : > { %1389 = shalt.err (!%p1386_p4)
}
 0x272   : > { %1287 = dma.vmem_to_hbm [thread:$0]  (%p1553_p5), %s1709_s17, 256, %s1707_s4, %s1003_s26, %s1431_s23, %s1431_s23, %s1432_s18  }
 0x273 PF: > { %s1792_s21 = sld [smem:[#allocation10_spill]]  ;;  %s1793_s24 = sld [smem:[#allocation8_spill]] }
 0x279   : > { %p1298_p7 = scmp.ge.s32.totalorder %s1792_s21, 2  ;;  %s1052_s27 = sand.u32 1, %s1793_s24  }
 0x27a   : > { %s1053_s16 = scalar_lea.sflag [#allocation3], %s1052_s27 }
 0x27b   : > { %p1292_p8 = pnand %p1298_p7, %p1557_p6 }
 0x27d   : > { %1407 = dma.done.wait (!%p1292_p8), %s1053_s16, 256  }
 0x27e   : > { %1409 = vsyncadd (!%p1292_p8), %s1053_s16, 4294967040  ;;  %s1062_s28 = scalar_lea.sflag [#allocation5], %s1052_s27 }
 0x27f   : > { %1411 = dma.done.wait (!%p1292_p8), %s1062_s28, 256  }
 0x280   : > { %1413 = vsyncadd (!%p1292_p8), %s1062_s28, 4294967040  ;;  %s1795_s21 = sld [smem:[#allocation11_spill]]  ;;  %s1796_s29 = sld [smem:[#allocation9_spill]] }
 0x281   : > { %s1797_s20 = sld [smem:[#allocation12_spill]]  ;;  %s1798_s18 = smov %s1420_s19 }
 0x286   : > { %p29_p5 = scmp.ge.s32.totalorder %s1795_s21, 4   ;;  %s1799_s19 = smov %s1796_s29 }
 0x288   :  { %31 = sbr.rel (!%p29_p5) target bundleno = 7 (0x7), region = 137 }
 0x28f   :  { %1067 = vsyncpa [#allocation3], 1 }
 0x290   :  { %1069 = vsyncpa [#allocation3 + $0x1], 1 }
 0x291   :  { %1070 = vsyncpa [#allocation5], 1 }
 0x292   :  { %1072 = vsyncpa [#allocation5 + $0x1], 1 }

</bundles_post_ra>
